<compile_context>
chip_gen: v6e
topology: v6e:2x2x1
jax: 0.10.0
libtpu: 0.0.40
codegen_flags: <defaults>
</compile_context>

<pallas_src>
import jax
import jax.numpy as jnp
from jax.experimental import pallas as pl
from jax.experimental.pallas import tpu as pltpu


def _binreg_kernel(x_ref, w_ref, o_ref):
    # x_ref: (tile_b, D), w_ref: (D, 1) f32, o_ref: (tile_b, 1)
    # MXU GEMV: streams the X tile through the MXU without materializing a
    # (tile_b, D) elementwise-product temporary in VMEM.
    o_ref[...] = jnp.dot(
        x_ref[...],
        w_ref[...],
        preferred_element_type=jnp.float32,
        precision=jax.lax.Precision.HIGHEST,  # full-f32 passes; MXU has slack
    ).astype(o_ref.dtype)


def _round8(n):
    return max(8, ((n + 7) // 8) * 8)


def _vmem_budget_bytes():
    """Generation-aware pipeline budget: ~3/8 of physical VMEM, capped."""
    try:
        cap = int(pltpu.get_tpu_info().vmem_capacity_bytes)
    except Exception:
        cap = 64 << 20  # assume the smallest (v7x) if the query is unavailable
    return max(16 << 20, min(48 << 20, (3 * cap) // 8))


def _choose_tile_b(batch, d, itemsize, budget_bytes):
    """Pick a batch tile (multiple of 8) sized by bytes against the budget."""
    # Bytes charged per batch row held in the pipeline:
    per_row = (
        2 * d * itemsize      # X tile, double buffered
        + 2 * 128 * 4         # (tile_b, 1) f32 out block, lane-padded, double buffered
        + 128 * 4             # headroom for the in-kernel (tile_b, 1) result value
    )
    w_bytes = 2 * _round8(d) * 128 * 4  # (d, 1) weight block, lane-padded, dbl buffered
    rows_by_bytes = max(8, ((budget_bytes - w_bytes) // per_row) // 8 * 8)
    tile = min(rows_by_bytes, _round8(batch))
    # Keep >= 4 grid steps for large batches (v7x has 2 TensorCores; a 1-step
    # grid leaves one idle), but never shrink a step below ~2 MiB of X so the
    # ~0.35 us/grid-step overhead stays amortized on single-core chips.
    min_rows = max(8, ((2 << 20) // (d * itemsize)) // 8 * 8)
    tile_for_4 = _round8(-(-batch // 4))
    if tile_for_4 >= min_rows:
        tile = min(tile, tile_for_4)
    return max(8, tile)


def binomial_regression_forward(x, w):
    """x: (batch, num_inputs); w: (num_inputs, 1) or (1, num_inputs) -> (batch,)"""
    B, D = x.shape
    assert w.size == D, f"weight has {w.size} elements, expected {D}"
    w_col = w.reshape(D, 1).astype(jnp.float32)  # keep weights in f32

    itemsize = jnp.dtype(x.dtype).itemsize
    budget = _vmem_budget_bytes()
    tile_b = _choose_tile_b(B, D, itemsize, budget)
    num_tiles = pl.cdiv(B, tile_b)
    out_rows = num_tiles * tile_b  # pad only the (tiny) output, never X

    # Real VMEM footprint of the pipeline (lane-padded blocks), plus slack for
    # Mosaic internals.
    footprint = (
        2 * tile_b * D * itemsize      # X double buffer
        + 2 * tile_b * 128 * 4         # out blocks (padded to 128 lanes)
        + tile_b * 128 * 4             # in-kernel result value
        + 2 * _round8(D) * 128 * 4     # weight block (padded to 128 lanes)
    )
    vmem_limit = int(max(footprint + (8 << 20), 16 << 20))

    out = pl.pallas_call(
        _binreg_kernel,
        out_shape=jax.ShapeDtypeStruct((out_rows, 1), x.dtype),
        grid_spec=pltpu.PrefetchScalarGridSpec(
            num_scalar_prefetch=0,
            grid=(num_tiles,),
            in_specs=[
                pl.BlockSpec((tile_b, D), lambda i: (i, 0)),  # stream X tiles
                pl.BlockSpec((D, 1), lambda i: (0, 0)),       # resident f32 weights
            ],
            out_specs=pl.BlockSpec((tile_b, 1), lambda i: (i, 0)),
        ),
        compiler_params=pltpu.CompilerParams(
            dimension_semantics=("parallel",),  # reduction-free batch axis
            vmem_limit_bytes=vmem_limit,
        ),
    )(x, w_col)
    return out[:B, 0]  # squeeze(-1) + drop rows produced by the ragged edge


def reference_forward(x, w):
    return (x @ w.reshape(-1, 1))[:, 0]


if __name__ == "__main__":
    key = jax.random.PRNGKey(0)
    kx, kw, kx2 = jax.random.split(key, 3)

    # Small shape consistent with the module.
    batch = 8
    num_inputs = 32

    x = jax.random.normal(kx, (batch, num_inputs), dtype=jnp.float32)
    # Deterministic init mimicking nn.Linear's uniform(-1/sqrt(fan_in), +1/sqrt(fan_in))
    bound = 1.0 / (num_inputs ** 0.5)
    w = jax.random.uniform(
        kw, (num_inputs, 1), dtype=jnp.float32, minval=-bound, maxval=bound
    )

    y = binomial_regression_forward(x, w)
    jax.block_until_ready(y)
    y_ref = reference_forward(x, w)
    assert y.shape == (batch,)
    assert jnp.allclose(y, y_ref, atol=1e-4, rtol=1e-4)

    # Second check: ragged batch (not a multiple of 8 or of the tile) ->
    # exercises the masked final X block with no padding pass over X.
    batch2, d2 = 2053, 128
    x2 = jax.random.normal(kx2, (batch2, d2), dtype=jnp.float32)
    w2 = jax.random.uniform(
        kw, (d2, 1), dtype=jnp.float32, minval=-1.0 / d2 ** 0.5, maxval=1.0 / d2 ** 0.5
    )
    y2 = binomial_regression_forward(x2, w2)
    jax.block_until_ready(y2)
    y2_ref = reference_forward(x2, w2)
    assert y2.shape == (batch2,)
    assert jnp.allclose(y2, y2_ref, atol=1e-4, rtol=1e-4)

    print("KERNEL_OK")
</pallas_src>

<mosaic_0001>
module attributes {stable_mosaic.version = 11 : i64} {
  func.func @_binreg_kernel(%arg0: i32, %arg1: memref<8x32xf32, #tpu.memory_space<vmem>>, %arg2: memref<32x1xf32, #tpu.memory_space<vmem>>, %arg3: memref<8x1xf32, #tpu.memory_space<vmem>>) attributes {dimension_semantics = [#tpu.dimension_semantics<parallel>], iteration_bounds = array<i64: 1>, scalar_prefetch = 0 : i64, scratch_operands = 0 : i64, tpu.core_type = #tpu.core_type<tc>, window_params = [{transform_indices = @transform_0, window_bounds = array<i64: 8, 32>}, {pipeline_mode = #tpu.pipeline_mode<synchronous>, transform_indices = @transform_1, window_bounds = array<i64: 32, 1>}, {transform_indices = @transform_2, window_bounds = array<i64: 8, 1>}]} {
    %c0 = arith.constant 0 : index
    %c0_0 = arith.constant 0 : index
    %0 = vector.load %arg1[%c0, %c0_0] : memref<8x32xf32, #tpu.memory_space<vmem>>, vector<8x32xf32>
    %c0_1 = arith.constant 0 : index
    %c0_2 = arith.constant 0 : index
    %1 = vector.load %arg2[%c0_1, %c0_2] : memref<32x1xf32, #tpu.memory_space<vmem>>, vector<32x1xf32>
    %cst = arith.constant dense<0.000000e+00> : vector<8x1xf32>
    %2 = tpu.matmul %0, %1, %cst {dimension_numbers = #tpu.dot_dimension_numbers<[1], [0], [0], [1], [0, 0, 1, 1], [], []>, precision = #tpu.contract_precision<fp32>} : vector<8x32xf32>, vector<32x1xf32>, vector<8x1xf32> -> vector<8x1xf32>
    %c0_3 = arith.constant 0 : index
    %c0_4 = arith.constant 0 : index
    %3 = vector.load %arg3[%c0_3, %c0_4] : memref<8x1xf32, #tpu.memory_space<vmem>>, vector<8x1xf32>
    tpu.vector_store %arg3[%c0_3, %c0_4], %2 {strides = array<i32>} : memref<8x1xf32, #tpu.memory_space<vmem>>, vector<8x1xf32>,
    return
  }
  func.func @transform_0(%arg0: i32) -> (i32, i32) {
    %c0_i32 = arith.constant 0 : i32
    %c0_i32_0 = arith.constant 0 : i32
    return %arg0, %c0_i32 : i32, i32
  }
  func.func @transform_1(%arg0: i32) -> (i32, i32) {
    %c0_i32 = arith.constant 0 : i32
    %c0_i32_0 = arith.constant 0 : i32
    %c0_i32_1 = arith.constant 0 : i32
    return %c0_i32, %c0_i32_0 : i32, i32
  }
  func.func @transform_2(%arg0: i32) -> (i32, i32) {
    %c0_i32 = arith.constant 0 : i32
    %c0_i32_0 = arith.constant 0 : i32
    return %arg0, %c0_i32 : i32, i32
  }
}

</mosaic_0001>

<bundles_post_ra>
// kernel: tpu_custom_call.1
= control target key start
LH: loop header
LB: loop body
LE: loop exit
PB: predicated region body
PF: predicated region fallthrough
CT: control target
= control target key end

     0   :  { %vm16_vm0 = vcmask 261120   ;;  %v609_v0 = vmov 0.0   ;;  %vm610_vm1 = vmmov 0   ;;  %vm505_vm2 = vcmask 7168   ;;  %s711_s1 = inlined_call_operand.vmem [shape: f32[32,1], index: 1, kind: input, shape index: {}]   ;;  %s712_s0 = inlined_call_operand.vmem [shape: f32[8,32], index: 0, kind: input, shape index: {}]   ;;  %s713_s2 = inlined_call_operand.vmem [shape: f32[8,1], index: 2, kind: output, shape index: {}]  }
   0x1   :  { %541 = vmatprep.subr.mxu0 %v609_v0  ;;  %v15_v1 = vld [vmem:[%s711_s1 + $0x18] sm:$0xff]  ;;  %v14_v2 = vld [vmem:[%s711_s1 + $0x10] sm:$0xff]  ;;  %v13_v3 = vld [vmem:[%s711_s1 + $0x8] sm:$0xff]  ;;  %552 = vmatprep.subr.mxu1 %v609_v0 }
   0x2   :  { %v637_v4 = vand.u32 4294901760, %v15_v1  ;;  %v639_v5 = vand.u32 4294901760, %v14_v2  ;;  %v641_v6 = vand.u32 4294901760, %v13_v3  ;;  %v12_v7 = vld [vmem:[%s711_s1] sm:$0xff]  ;;  %549 = vmatprep.mubr.msk.f32.mxu0 %vm610_vm1, %v609_v0  ;;  %560 = vmatprep.mubr.msk.f32.mxu1 %vm610_vm1, %v609_v0 }
   0x3   :  { %v11_v8 = vld [vmem:[%s712_s0] sm:$0xff]  ;;  %v653_v9 = vand.u32 4294901760, %v12_v7 }
   0x4   :  { %v18_v10 = vsel %vm16_vm0, %v11_v8, 0  ;;  %542 = vmatpush3.msra.mxu0 %v637_v4  ;;  %v125_v11 = vsub.f32 %v15_v1, %v637_v4  ;;  %v132_v13 = vsub.f32 %v14_v2, %v639_v5  ;;  %v139_v14 = vsub.f32 %v13_v3, %v641_v6 }
   0x5   :  { %v658_v12 = vand.u32 4294901760, %v18_v10  ;;  %543 = vmatprep.subr.mxu0 %v609_v0  ;;  %v146_v15 = vsub.f32 %v12_v7, %v653_v9 }
   0x6   :  { %544 = vmatpush3.msra.mxu0 %v639_v5  ;;  %v126_v16 = vand.u32 4294901760, %v125_v11  ;;  %v133_v18 = vand.u32 4294901760, %v132_v13  ;;  %v140_v19 = vand.u32 4294901760, %v139_v14 }
   0x7   :  { %v90_v17 = vsub.f32 %v18_v10, %v658_v12  ;;  %545 = vmatprep.subr.mxu0 %v609_v0  ;;  %v147_v20 = vand.u32 4294901760, %v146_v15 }
   0x8   :  { %546 = vmatpush3.msra.mxu0 %v641_v6  ;;  %v127_v21 = vsub.f32 %v125_v11, %v126_v16  ;;  %v134_v23 = vsub.f32 %v132_v13, %v133_v18  ;;  %v141_v24 = vsub.f32 %v139_v14, %v140_v19 }
   0x9   :  { %v91_v22 = vand.u32 4294901760, %v90_v17  ;;  %547 = vmatprep.subr.mxu0 %v609_v0  ;;  %v148_v28 = vsub.f32 %v146_v15, %v147_v20 }
   0xa   :  { %548 = vmatpush3.msra.mxu0 %v653_v9  ;;  %v128_v25 = vand.u32 4294901760, %v127_v21  ;;  %v135_v27 = vand.u32 4294901760, %v134_v23  ;;  %v142_v30 = vand.u32 4294901760, %v141_v24 }
   0xb   :  { %v92_v26 = vsub.f32 %v90_v17, %v91_v22  ;;  %563 = vmatprep.subr.mxu0 %v609_v0  ;;  %v149_v31 = vand.u32 4294901760, %v148_v28 }
   0xc   :  { %553 = vmatpush3.msra.mxu1 %v128_v25 }
   0xd   :  { %v93_v29 = vand.u32 4294901760, %v92_v26  ;;  %554 = vmatprep.subr.mxu1 %v609_v0 }
   0xe   :  { %555 = vmatpush3.msra.mxu1 %v135_v27 }
   0xf   :  { %550 = vmatmul.mubr.f32.vlgmr.msra.gmra.mxu0 %v93_v29  ;;  %556 = vmatprep.subr.mxu1 %v609_v0 }
  0x10   :  { %564 = vmatpush3.msra.mxu0 %v125_v11  ;;  %557 = vmatpush3.msra.mxu1 %v142_v30 }
  0x11   :  { %565 = vmatprep.subr.mxu0 %v609_v0  ;;  %558 = vmatprep.subr.mxu1 %v609_v0 }
  0x12   :  { %566 = vmatpush3.msra.mxu0 %v132_v13  ;;  %559 = vmatpush3.msra.mxu1 %v149_v31 }
  0x13   :  { %567 = vmatprep.subr.mxu0 %v609_v0  ;;  %561 = vmatmul.mubr.f32.vlgmr.msra.gmra.mxu1 %v658_v12 }
  0x14   :  { %568 = vmatpush3.msra.mxu0 %v139_v14  ;;  %574 = vmatprep.subr.mxu1 %v609_v0 }
  0x15   :  { %569 = vmatprep.subr.mxu0 %v609_v0  ;;  %571 = vmatprep.mubr.msk.f32.mxu0 %vm610_vm1, %v609_v0 }
  0x16   :  { %570 = vmatpush3.msra.mxu0 %v146_v15  ;;  %575 = vmatpush3.msra.mxu1 %v637_v4 }
  0x17   :  { %572 = vmatmul.mubr.f32.vlgmr.msra.gmra.mxu0 %v90_v17  ;;  %576 = vmatprep.subr.mxu1 %v609_v0 }
  0x18   :  { %585 = vmatprep.subr.mxu0 %v609_v0  ;;  %577 = vmatpush3.msra.mxu1 %v639_v5 }
  0x19   :  { %586 = vmatpush3.msra.mxu0 %v126_v16  ;;  %578 = vmatprep.subr.mxu1 %v609_v0 }
  0x1a   :  { %587 = vmatprep.subr.mxu0 %v609_v0  ;;  %579 = vmatpush3.msra.mxu1 %v641_v6 }
  0x1b   :  { %588 = vmatpush3.msra.mxu0 %v133_v18  ;;  %580 = vmatprep.subr.mxu1 %v609_v0 }
  0x1c   :  { %589 = vmatprep.subr.mxu0 %v609_v0  ;;  %581 = vmatpush3.msra.mxu1 %v653_v9 }
  0x1d   :  { %582 = vmatprep.mubr.msk.f32.mxu1 %vm610_vm1, %v609_v0  ;;  %590 = vmatpush3.msra.mxu0 %v140_v19 }
  0x1e   :  { %583 = vmatmul.mubr.f32.vlgmr.msra.gmra.mxu1 %v91_v22  ;;  %591 = vmatprep.subr.mxu0 %v609_v0 }
  0x1f   :  { %596 = vmatprep.subr.mxu1 %v609_v0  ;;  %592 = vmatpush3.msra.mxu0 %v147_v20 }
  0x20   :  { %593 = vmatprep.mubr.msk.f32.mxu0 %vm610_vm1, %v609_v0  ;;  %597 = vmatpush3.msra.mxu1 %v637_v4 }
  0x21   :  { %594 = vmatmul.mubr.f32.vlgmr.msra.gmra.mxu0 %v658_v12  ;;  %598 = vmatprep.subr.mxu1 %v609_v0 }
  0x22   :  { %604 = vmatprep.mubr.msk.f32.mxu1 %vm610_vm1, %v609_v0  ;;  %599 = vmatpush3.msra.mxu1 %v639_v5 }
  0x23   :  { %600 = vmatprep.subr.mxu1 %v609_v0 }
  0x24   :  { %601 = vmatpush3.msra.mxu1 %v641_v6 }
  0x25   :  { %602 = vmatprep.subr.mxu1 %v609_v0 }
  0x26   :  { %603 = vmatpush3.msra.mxu1 %v653_v9 }
  0x27   :  { %605 = vmatmul.mubr.f32.vlgmr.msra.gmra.mxu1 %v658_v12 }
  0xcf   :  { %v95_v32 = vpop.f32.mrf.mxu0 }
  0xd1   :  { %v551_v33 = vpop.f32.mrf.mxu0 }
  0xd3   :  { %v186_v34 = vpop.f32.mrf.mxu1 }
  0xd4   :  { %v187_v38 = vadd.f32 %v186_v34, %v95_v32 }
  0xd5   :  { %v562_v35 = vpop.f32.mrf.mxu1 }
  0xd7   :  { %v266_v36 = vpop.f32.mrf.mxu0 }
  0xd8   :  { %v267_v41 = vadd.f32 %v266_v36, %v187_v38 }
  0xd9   :  { %v573_v37 = vpop.f32.mrf.mxu0 }
  0xde   :  { %v343_v39 = vpop.f32.mrf.mxu1 }
  0xdf   :  { %v344_v43 = vadd.f32 %v343_v39, %v267_v41 }
  0xe0   :  { %v584_v40 = vpop.f32.mrf.mxu1 }
  0xe1   :  { %v426_v42 = vpop.f32.mrf.mxu0 }
  0xe2   :  { %v427_v45 = vadd.f32 %v426_v42, %v344_v43 }
  0xe3   :  { %v595_v44 = vpop.f32.mrf.mxu0 }
  0xe7   :  { %v501_v46 = vpop.f32.mrf.mxu1 }
  0xe8   :  { %v502_v47 = vadd.f32 %v501_v46, %v427_v45 }
  0xe9   :  { %v606_v48 = vpop.f32.mrf.mxu1 }
  0xea   :  { %506 = vst.msk [vmem:[%s713_s2] sm:$0xff] %vm505_vm2, %v502_v47 }

</bundles_post_ra>
